<compile_context>
chip_gen: v7x
topology: tpu7x:2x2x1
jax: 0.10.0
libtpu: 0.0.40
codegen_flags: <defaults>
</compile_context>

<pallas_src>
import functools

import jax
import jax.numpy as jnp
from jax.experimental import pallas as pl
from jax.experimental.pallas import tpu as pltpu


def _quantization_kernel(x_ref, o_ref, *, half_levels, two_over_levels):
    # Compute in f32 (cheap; exact for the quantization grid), store in I/O dtype.
    x = x_ref[...].astype(jnp.float32)
    x = jnp.clip(x, -1.0, 1.0)
    # round(((x+1)/2) * L) folded into one FMA: round(x*(L/2) + L/2)
    q = jnp.round(x * half_levels + half_levels)
    # (q / L) * 2 - 1 folded into one multiply-subtract with a precomputed constant.
    o_ref[...] = (q * two_over_levels - 1.0).astype(o_ref.dtype)


def _lane_width(n):
    """Largest convenient multiple of 128 that divides n (lane-dense last dim)."""
    for k in (2048, 1024, 512, 384, 256, 128):
        if n % k == 0:
            return k
    return None


def quantization_forward(x, bit_width, block_budget_bytes=2 * 1024 * 1024):
    """x: [B, C, H, W] (any float dtype). Returns same shape/dtype."""
    orig_shape = x.shape
    n = x.size
    dtype_bytes = jnp.dtype(x.dtype).itemsize

    levels = float(2 ** bit_width - 1)
    half_levels = 0.5 * levels
    two_over_levels = 2.0 / levels

    # --- Layout: lane-dense 2-D slab -------------------------------------
    k = _lane_width(n)
    if k is not None:
        rows, cols = n // k, k
    else:
        # Fallback: keep the original last dim (Pallas masks partial lanes).
        cols = orig_shape[-1]
        rows = n // cols
    x2d = x.reshape(rows, cols)

    # --- Byte-budgeted row tiling (multiple of 8 sublanes) ----------------
    max_rows = max(1, block_budget_bytes // (cols * dtype_bytes))
    if rows <= max_rows:
        tile_rows = rows                      # whole slab already small (<~2 MiB)
    else:
        tile_rows = max(8, (max_rows // 8) * 8)
    grid = (pl.cdiv(rows, tile_rows),)

    kernel = functools.partial(
        _quantization_kernel,
        half_levels=half_levels,
        two_over_levels=two_over_levels,
    )

    out2d = pl.pallas_call(
        kernel,
        out_shape=jax.ShapeDtypeStruct((rows, cols), x.dtype),
        grid_spec=pltpu.PrefetchScalarGridSpec(
            num_scalar_prefetch=0,
            grid=grid,
            in_specs=[pl.BlockSpec((tile_rows, cols), lambda i: (i, 0))],
            out_specs=pl.BlockSpec((tile_rows, cols), lambda i: (i, 0)),
        ),
        input_output_aliases={0: 0},  # in-place when caller donates the buffer
        cost_estimate=pl.CostEstimate(
            flops=4 * n,
            transcendentals=0,
            bytes_accessed=2 * n * dtype_bytes,
        ),
        compiler_params=pltpu.CompilerParams(
            dimension_semantics=("parallel",),
        ),
    )(x2d)

    return out2d.reshape(orig_shape)


def quantization_reference(x, bit_width):
    """PyTorch-faithful (unfolded) reference."""
    levels = float(2 ** bit_width - 1)
    x = jnp.clip(x, -1.0, 1.0)
    x01 = (x + 1.0) / 2.0
    q = jnp.round(x01 * levels) / levels
    return q * 2.0 - 1.0


if __name__ == "__main__":
    key = jax.random.PRNGKey(0)
    B, C, H, W = 2, 4, 16, 16
    bit_width = 4  # module hyperparameter (module has no trainable weights)

    # Inputs spanning outside [-1, 1] to exercise the clamp.
    x = jax.random.uniform(key, (B, C, H, W), jnp.float32, minval=-1.5, maxval=1.5)

    out = quantization_forward(x, bit_width)
    out = jax.block_until_ready(out)

    ref = quantization_reference(x, bit_width)
    assert out.shape == x.shape and out.dtype == x.dtype
    assert jnp.allclose(out, ref, atol=1e-5), "mismatch vs reference"

    print("KERNEL_OK")
</pallas_src>

<mosaic_0001>
module attributes {stable_mosaic.version = 11 : i64} {
  func.func @_quantization_kernel(%arg0: i32, %arg1: memref<1x2048xf32, #tpu.memory_space<vmem>>, %arg2: memref<1x2048xf32, #tpu.memory_space<vmem>>) attributes {dimension_semantics = [#tpu.dimension_semantics<parallel>], iteration_bounds = array<i64: 1>, scalar_prefetch = 0 : i64, scratch_operands = 0 : i64, tpu.core_type = #tpu.core_type<tc>, window_params = [{transform_indices = @transform_0, window_bounds = array<i64: 1, 2048>}, {transform_indices = @transform_1, window_bounds = array<i64: 1, 2048>}]} {
    %c0 = arith.constant 0 : index
    %c0_0 = arith.constant 0 : index
    %0 = vector.load %arg1[%c0, %c0_0] : memref<1x2048xf32, #tpu.memory_space<vmem>>, vector<1x2048xf32>
    %cst = arith.constant -1.000000e+00 : f32
    %cst_1 = arith.constant 1.000000e+00 : f32
    %1 = vector.broadcast %cst : f32 to vector<1x2048xf32>
    %2 = arith.maximumf %1, %0 : vector<1x2048xf32>
    %3 = vector.broadcast %cst_1 : f32 to vector<1x2048xf32>
    %4 = arith.minimumf %3, %2 : vector<1x2048xf32>
    %cst_2 = arith.constant 7.500000e+00 : f32
    %5 = vector.broadcast %cst_2 : f32 to vector<1x2048xf32>
    %6 = arith.mulf %4, %5 : vector<1x2048xf32>
    %cst_3 = arith.constant 7.500000e+00 : f32
    %7 = vector.broadcast %cst_3 : f32 to vector<1x2048xf32>
    %8 = arith.addf %6, %7 : vector<1x2048xf32>
    %9 = math.roundeven %8 : vector<1x2048xf32>
    %cst_4 = arith.constant 0.13333334 : f32
    %10 = vector.broadcast %cst_4 : f32 to vector<1x2048xf32>
    %11 = arith.mulf %9, %10 : vector<1x2048xf32>
    %cst_5 = arith.constant 1.000000e+00 : f32
    %12 = vector.broadcast %cst_5 : f32 to vector<1x2048xf32>
    %13 = arith.subf %11, %12 : vector<1x2048xf32>
    %c0_6 = arith.constant 0 : index
    %c0_7 = arith.constant 0 : index
    %14 = vector.load %arg2[%c0_6, %c0_7] : memref<1x2048xf32, #tpu.memory_space<vmem>>, vector<1x2048xf32>
    tpu.vector_store %arg2[%c0_6, %c0_7], %13 {strides = array<i32>} : memref<1x2048xf32, #tpu.memory_space<vmem>>, vector<1x2048xf32>,
    return
  }
  func.func @transform_0(%arg0: i32) -> (i32, i32) {
    %c0_i32 = arith.constant 0 : i32
    %c0_i32_0 = arith.constant 0 : i32
    return %arg0, %c0_i32 : i32, i32
  }
  func.func @transform_1(%arg0: i32) -> (i32, i32) {
    %c0_i32 = arith.constant 0 : i32
    %c0_i32_0 = arith.constant 0 : i32
    return %arg0, %c0_i32 : i32, i32
  }
}

</mosaic_0001>

<bundles_post_ra>
// kernel: tpu_custom_call.1
= control target key start
LH: loop header
LB: loop body
LE: loop exit
PB: predicated region body
PF: predicated region fallthrough
CT: control target
= control target key end

     0   :  { %6 = vsyncpa [#allocation3], 0  ;;  %s146_s0 = inlined_call_operand.hbm [shape: f32[1,2048], index: 0, kind: input, shape index: {}, may-alias: {0,1}]   ;;  %s147_s1 = inlined_call_operand.hbm [shape: f32[1,2048], index: 1, kind: output, shape index: {}, may-alias: {0,1}]  }
   0x1   :  { %7 = vsyncpa [#allocation4], 0  ;;  %s110_s6 = smov [#allocation2]   ;;  %s62_s10 = scalar_lea.hbm %s146_s0, 256 }
   0x2   :  { %s14_s7 = sshll.u32 %s110_s6, 4  ;;  %p63_p0 = scmp.ne.s32.totalorder %s146_s0, %s62_s10  ;;  %s15_s7 = int_to_ptr.vmem [resolvable:$true] %s14_s7 }
   0x3   :  { %p66_p1 = scmp.lt.u32.totalorder %s62_s10, %s146_s0 }
   0x5   :  { %p68_p2 = pnand %p66_p1, %p63_p0 }
   0x7   :  { %71 = shalt.err (!%p68_p2)
}
   0x8   :  { %s72_s15 = scalar_lea.vmem %s15_s7, 256  ;;  %p77_p4 = scmp.lt.s32.totalorder %s15_s7, %s15_s7 }
   0x9   :  { %p73_p3 = scmp.ne.s32.totalorder %s15_s7, %s72_s15  ;;  %p78_p5 = scmp.lt.s32.totalorder %s72_s15, %s72_s15 }
   0xb   :  { %p79_p6 = por %p78_p5, %p77_p4 }
   0xd   :  { %p80_p7 = pnand %p79_p6, %p73_p3 }
   0xf   :  { %83 = shalt.err (!%p80_p7)
}
  0x10   :  { %17 = dma.hbm_to_vmem [thread:$0]  %s146_s0, 256, %s15_s7, [#allocation3]  }
  0x11   :  { %106 = dma.done.wait [#allocation3], 256  }
  0x12   :  { %107 = vsyncadd [#allocation3], 4294967040  ;;  %v21_v0 = vld [vmem:[#allocation2] sm:$0xff]  ;;  %v22_v1 = vld [vmem:[#allocation2 + $0x8] sm:$0xff]  ;;  %s111_s18 = smov [#allocation5]  }
  0x13   :  { %v54_v2 = vclamps-f32 %v21_v0, 1.0  ;;  %v55_v3 = vclamps-f32 %v22_v1, 1.0  ;;  %s45_s19 = sshll.u32 %s111_s18, 4  ;;  %s46_s19 = int_to_ptr.vmem [resolvable:$true] %s45_s19 }
  0x14   :  { %s84_s0 = scalar_lea.vmem %s46_s19, 256  ;;  %p89_p9 = scmp.lt.s32.totalorder %s46_s19, %s46_s19 }
  0x15   :  { %v27_v4 = vmul.f32 7.5, %v54_v2  ;;  %v28_v5 = vmul.f32 7.5, %v55_v3  ;;  %p85_p8 = scmp.ne.s32.totalorder %s46_s19, %s84_s0  ;;  %p90_p10 = scmp.lt.s32.totalorder %s84_s0, %s84_s0 }
  0x17   :  { %v29_v6 = vadd.f32 7.5, %v27_v4  ;;  %v30_v7 = vadd.f32 7.5, %v28_v5  ;;  %p91_p11 = por %p90_p10, %p89_p9 }
  0x19   :  { %v58_v8 = vround.rtne.f32 %v29_v6  ;;  %v59_v9 = vround.rtne.f32 %v30_v7  ;;  %p92_p12 = pnand %p91_p11, %p85_p8 }
  0x1b   :  { %v33_v10 = vmul.f32 0.13333334, %v58_v8  ;;  %v34_v11 = vmul.f32 0.13333334, %v59_v9 }
  0x1d   :  { %v56_v12 = vadd.f32 -1.0, %v33_v10  ;;  %v57_v13 = vadd.f32 -1.0, %v34_v11 }
  0x1f   :  { %37 = vst [vmem:[#allocation5] sm:$0xff] %v56_v12  ;;  %38 = vst [vmem:[#allocation5 + $0x8] sm:$0xff] %v57_v13 }
  0x20   :  { %95 = shalt.err (!%p92_p12)
}
  0x21   :  { %s96_s22 = scalar_lea.hbm %s147_s1, 256 }
  0x22   :  { %p97_p13 = scmp.ne.s32.totalorder %s147_s1, %s96_s22  ;;  %p100_p0 = scmp.lt.u32.totalorder %s96_s22, %s147_s1 }
  0x24   :  { %p102_p1 = pnand %p100_p0, %p97_p13 }
  0x26   :  { %105 = shalt.err (!%p102_p1)
}
  0x27   :  { %48 = dma.vmem_to_hbm [thread:$0]  %s46_s19, 256, %s147_s1, [#allocation4]  }
  0x28   :  { %108 = dma.done.wait [#allocation4], 256  }
  0x29   :  { %109 = vsyncadd [#allocation4], 4294967040 }
  0x2a   :  { %52 = vsyncpa [#allocation3], 1 }
  0x2b   :  { %53 = vsyncpa [#allocation4], 1 }

</bundles_post_ra>
